<compile_context>
chip_gen: v6e
topology: v6e:2x2x1
jax: 0.10.0
libtpu: 0.0.40
codegen_flags: <defaults>
</compile_context>

<pallas_src>
import jax
import jax.numpy as jnp
from jax.experimental import pallas as pl
from jax.experimental.pallas import tpu as pltpu  # noqa: F401  (kept for TPU-specific tuning hooks)


def make_lstm_kernel(seq_len, batch, hidden):
    """Build the single-invocation LSTM kernel (static S/B/H baked in)."""
    H = hidden

    def lstm_kernel(
        x_ref,      # (S*B, I)     time-major, flattened input
        wx_ref,     # (I, 3H)      fused [i|o|c] input weights
        wh_ref,     # (H, 3H)      fused [i|o|c] hidden weights
        b_ref,      # (1, 3H)      fused bias
        wfc_ref,    # (H, O_pad)   final fc weights, zero-padded to 128-lane multiple
        bfc_ref,    # (1, O_pad)   final fc bias,   zero-padded to 128-lane multiple
        out_ref,    # (B, O_pad)   lane-dense padded output slab
    ):
        # Hoisted input projection for all timesteps at once (no recurrent dependency),
        # with the fused bias folded in -> (S*B, 3H).
        xproj = (
            jnp.dot(x_ref[...], wx_ref[...], preferred_element_type=jnp.float32)
            + b_ref[...]
        )
        wh = wh_ref[...]  # load once; resident in vregs/VMEM across the recurrence

        h = jnp.zeros((batch, H), jnp.float32)
        c = jnp.zeros((batch, H), jnp.float32)

        # Short, fixed recurrence: fully unrolled (static trip count) so only a single
        # small matmul + EUP ops sit on the serial critical path per step.
        for t in range(seq_len):
            gates = xproj[t * batch:(t + 1) * batch, :] + jnp.dot(
                h, wh, preferred_element_type=jnp.float32
            )  # (B, 3H)
            i_t = jax.nn.sigmoid(gates[:, :H])
            o_t = jax.nn.sigmoid(gates[:, H:2 * H])
            c_hat = jnp.tanh(gates[:, 2 * H:])
            c = c + i_t * c_hat          # no forget gate in this variant
            h = o_t * jnp.tanh(c)

        # Final fully-connected layer into the lane-dense padded slab -> single unmasked
        # vst writeback (padding columns are zeros from the zero-padded weights/bias).
        out_ref[...] = (
            jnp.dot(h, wfc_ref[...], preferred_element_type=jnp.float32)
            + bfc_ref[...]
        ).astype(out_ref.dtype)

    return lstm_kernel


def lstm_forward(x, params):
    """x: (batch, seq, input_dim) float32. Returns (batch, output_dim)."""
    B, S, I = x.shape
    H = params["wxi"].shape[1]
    O = params["wfc"].shape[1]
    O_pad = max(128, -(-O // 128) * 128)  # lane-dense output width

    # Fuse gate weights: [i | o | c] along the output dim.
    wx = jnp.concatenate([params["wxi"], params["wxo"], params["wxc"]], axis=1)  # (I, 3H)
    wh = jnp.concatenate([params["whi"], params["who"], params["whc"]], axis=1)  # (H, 3H)
    b = jnp.concatenate([params["bi"], params["bo"], params["bc"]], axis=1)      # (1, 3H)

    # Zero-pad the fc layer to a 128-lane multiple so the kernel's only HBM writeback
    # is an unmasked lane-dense store; extra columns are exact zeros and sliced off below.
    wfc = jnp.zeros((H, O_pad), jnp.float32).at[:, :O].set(params["wfc"])
    bfc = jnp.zeros((1, O_pad), jnp.float32).at[:, :O].set(params["bfc"])

    # Time-major and flattened so the kernel does one (S*B, I) @ (I, 3H) projection.
    x_tm = jnp.transpose(x, (1, 0, 2)).reshape(S * B, I)

    kernel = make_lstm_kernel(S, B, H)

    # Everything (inputs + weights, a few KiB total) lives in VMEM for the single
    # invocation; no grid / pipelining needed at these sizes.
    out_padded = pl.pallas_call(
        kernel,
        out_shape=jax.ShapeDtypeStruct((B, O_pad), jnp.float32),
    )(x_tm, wx, wh, b, wfc, bfc)

    return out_padded[:, :O]


def init_params(key, input_dim, hidden_dim, output_dim):
    """Deterministic init mimicking nn.Linear (uniform +/- 1/sqrt(fan_in)).
    Weights stored transposed: (fan_in, fan_out)."""
    keys = jax.random.split(key, 8)
    fan_cell = input_dim + hidden_dim
    bound_cell = 1.0 / jnp.sqrt(fan_cell)
    bound_fc = 1.0 / jnp.sqrt(hidden_dim)

    def lin(k, fan_in, fan_out, bound):
        kw, kb = jax.random.split(k)
        w = jax.random.uniform(kw, (fan_in, fan_out), jnp.float32, -bound, bound)
        bb = jax.random.uniform(kb, (1, fan_out), jnp.float32, -bound, bound)
        return w, bb

    w_i, b_i = lin(keys[0], fan_cell, hidden_dim, bound_cell)
    w_o, b_o = lin(keys[1], fan_cell, hidden_dim, bound_cell)
    w_c, b_c = lin(keys[2], fan_cell, hidden_dim, bound_cell)
    w_fc, b_fc = lin(keys[3], hidden_dim, output_dim, bound_fc)

    return {
        "wxi": w_i[:input_dim], "whi": w_i[input_dim:], "bi": b_i,
        "wxo": w_o[:input_dim], "who": w_o[input_dim:], "bo": b_o,
        "wxc": w_c[:input_dim], "whc": w_c[input_dim:], "bc": b_c,
        "wfc": w_fc, "bfc": b_fc,
    }


def lstm_reference(x, params):
    """Pure-JAX reference for correctness check (mirrors the PyTorch module)."""
    B = x.shape[0]
    H = params["wxi"].shape[1]

    def step(carry, x_t):
        h, c = carry
        i_t = jax.nn.sigmoid(x_t @ params["wxi"] + h @ params["whi"] + params["bi"])
        o_t = jax.nn.sigmoid(x_t @ params["wxo"] + h @ params["who"] + params["bo"])
        c_hat = jnp.tanh(x_t @ params["wxc"] + h @ params["whc"] + params["bc"])
        c_t = c + i_t * c_hat
        h_t = o_t * jnp.tanh(c_t)
        return (h_t, c_t), None

    h0 = jnp.zeros((B, H), jnp.float32)
    c0 = jnp.zeros((B, H), jnp.float32)
    (h_T, _), _ = jax.lax.scan(step, (h0, c0), jnp.transpose(x, (1, 0, 2)))
    return h_T @ params["wfc"] + params["bfc"]


if __name__ == "__main__":
    BATCH, SEQ, INPUT_DIM, HIDDEN_DIM, OUTPUT_DIM = 8, 8, 16, 32, 8

    key = jax.random.PRNGKey(0)
    kx, kp = jax.random.split(key)
    x = jax.random.normal(kx, (BATCH, SEQ, INPUT_DIM), jnp.float32)
    params = init_params(kp, INPUT_DIM, HIDDEN_DIM, OUTPUT_DIM)

    out = lstm_forward(x, params)
    out = jax.block_until_ready(out)

    ref = lstm_reference(x, params)
    assert out.shape == (BATCH, OUTPUT_DIM)
    assert jnp.allclose(out, ref, atol=1e-5, rtol=1e-5), (
        f"max abs diff {jnp.max(jnp.abs(out - ref))}"
    )
    print("KERNEL_OK")
</pallas_src>

<mosaic_0001>
module attributes {stable_mosaic.version = 11 : i64} {
  func.func @lstm_kernel(%arg0: memref<64x16xf32, #tpu.memory_space<vmem>>, %arg1: memref<16x96xf32, #tpu.memory_space<vmem>>, %arg2: memref<32x96xf32, #tpu.memory_space<vmem>>, %arg3: memref<1x96xf32, #tpu.memory_space<vmem>>, %arg4: memref<32x128xf32, #tpu.memory_space<vmem>>, %arg5: memref<1x128xf32, #tpu.memory_space<vmem>>, %arg6: memref<8x128xf32, #tpu.memory_space<vmem>>) attributes {dimension_semantics = [], scalar_prefetch = 0 : i64, scratch_operands = 0 : i64, tpu.core_type = #tpu.core_type<tc>} {
    %c0 = arith.constant 0 : index
    %c0_0 = arith.constant 0 : index
    %0 = vector.load %arg0[%c0, %c0_0] : memref<64x16xf32, #tpu.memory_space<vmem>>, vector<64x16xf32>
    %c0_1 = arith.constant 0 : index
    %c0_2 = arith.constant 0 : index
    %1 = vector.load %arg1[%c0_1, %c0_2] : memref<16x96xf32, #tpu.memory_space<vmem>>, vector<16x96xf32>
    %cst = arith.constant dense<0.000000e+00> : vector<64x96xf32>
    %2 = tpu.matmul %0, %1, %cst {dimension_numbers = #tpu.dot_dimension_numbers<[1], [0], [0], [1], [0, 0, 1, 1], [], []>} : vector<64x16xf32>, vector<16x96xf32>, vector<64x96xf32> -> vector<64x96xf32>
    %c0_3 = arith.constant 0 : index
    %c0_4 = arith.constant 0 : index
    %3 = vector.load %arg3[%c0_3, %c0_4] : memref<1x96xf32, #tpu.memory_space<vmem>>, vector<1x96xf32>
    %4 = vector.broadcast %3 : vector<1x96xf32> to vector<64x96xf32>
    %5 = arith.addf %2, %4 : vector<64x96xf32>
    %c0_5 = arith.constant 0 : index
    %c0_6 = arith.constant 0 : index
    %6 = vector.load %arg2[%c0_5, %c0_6] : memref<32x96xf32, #tpu.memory_space<vmem>>, vector<32x96xf32>
    %cst_7 = arith.constant 0.000000e+00 : f32
    %7 = vector.broadcast %cst_7 : f32 to vector<8x32xf32>
    %cst_8 = arith.constant 0.000000e+00 : f32
    %8 = vector.broadcast %cst_8 : f32 to vector<8x32xf32>
    %9 = vector.extract_strided_slice %5 {offsets = [0, 0], sizes = [8, 96], strides = [1, 1]} : vector<64x96xf32> to vector<8x96xf32>
    %cst_9 = arith.constant dense<0.000000e+00> : vector<8x96xf32>
    %10 = tpu.matmul %7, %6, %cst_9 {dimension_numbers = #tpu.dot_dimension_numbers<[1], [0], [0], [1], [0, 0, 1, 1], [], []>} : vector<8x32xf32>, vector<32x96xf32>, vector<8x96xf32> -> vector<8x96xf32>
    %11 = arith.addf %9, %10 : vector<8x96xf32>
    %12 = vector.extract_strided_slice %11 {offsets = [0, 0], sizes = [8, 32], strides = [1, 1]} : vector<8x96xf32> to vector<8x32xf32>
    %13 = arith.negf %12 : vector<8x32xf32>
    %14 = math.exp %13 : vector<8x32xf32>
    %cst_10 = arith.constant 1.000000e+00 : f32
    %15 = vector.broadcast %cst_10 : f32 to vector<8x32xf32>
    %16 = arith.addf %15, %14 : vector<8x32xf32>
    %17 = arith.divf %15, %16 : vector<8x32xf32>
    %18 = vector.extract_strided_slice %11 {offsets = [0, 32], sizes = [8, 32], strides = [1, 1]} : vector<8x96xf32> to vector<8x32xf32>
    %19 = arith.negf %18 : vector<8x32xf32>
    %20 = math.exp %19 : vector<8x32xf32>
    %cst_11 = arith.constant 1.000000e+00 : f32
    %21 = vector.broadcast %cst_11 : f32 to vector<8x32xf32>
    %22 = arith.addf %21, %20 : vector<8x32xf32>
    %23 = arith.divf %21, %22 : vector<8x32xf32>
    %24 = vector.extract_strided_slice %11 {offsets = [0, 64], sizes = [8, 32], strides = [1, 1]} : vector<8x96xf32> to vector<8x32xf32>
    %25 = math.tanh %24 : vector<8x32xf32>
    %26 = arith.mulf %17, %25 : vector<8x32xf32>
    %27 = arith.addf %8, %26 : vector<8x32xf32>
    %28 = math.tanh %27 : vector<8x32xf32>
    %29 = arith.mulf %23, %28 : vector<8x32xf32>
    %30 = vector.extract_strided_slice %5 {offsets = [8, 0], sizes = [8, 96], strides = [1, 1]} : vector<64x96xf32> to vector<8x96xf32>
    %cst_12 = arith.constant dense<0.000000e+00> : vector<8x96xf32>
    %31 = tpu.matmul %29, %6, %cst_12 {dimension_numbers = #tpu.dot_dimension_numbers<[1], [0], [0], [1], [0, 0, 1, 1], [], []>} : vector<8x32xf32>, vector<32x96xf32>, vector<8x96xf32> -> vector<8x96xf32>
    %32 = arith.addf %30, %31 : vector<8x96xf32>
    %33 = vector.extract_strided_slice %32 {offsets = [0, 0], sizes = [8, 32], strides = [1, 1]} : vector<8x96xf32> to vector<8x32xf32>
    %34 = arith.negf %33 : vector<8x32xf32>
    %35 = math.exp %34 : vector<8x32xf32>
    %cst_13 = arith.constant 1.000000e+00 : f32
    %36 = vector.broadcast %cst_13 : f32 to vector<8x32xf32>
    %37 = arith.addf %36, %35 : vector<8x32xf32>
    %38 = arith.divf %36, %37 : vector<8x32xf32>
    %39 = vector.extract_strided_slice %32 {offsets = [0, 32], sizes = [8, 32], strides = [1, 1]} : vector<8x96xf32> to vector<8x32xf32>
    %40 = arith.negf %39 : vector<8x32xf32>
    %41 = math.exp %40 : vector<8x32xf32>
    %cst_14 = arith.constant 1.000000e+00 : f32
    %42 = vector.broadcast %cst_14 : f32 to vector<8x32xf32>
    %43 = arith.addf %42, %41 : vector<8x32xf32>
    %44 = arith.divf %42, %43 : vector<8x32xf32>
    %45 = vector.extract_strided_slice %32 {offsets = [0, 64], sizes = [8, 32], strides = [1, 1]} : vector<8x96xf32> to vector<8x32xf32>
    %46 = math.tanh %45 : vector<8x32xf32>
    %47 = arith.mulf %38, %46 : vector<8x32xf32>
    %48 = arith.addf %27, %47 : vector<8x32xf32>
    %49 = math.tanh %48 : vector<8x32xf32>
    %50 = arith.mulf %44, %49 : vector<8x32xf32>
    %51 = vector.extract_strided_slice %5 {offsets = [16, 0], sizes = [8, 96], strides = [1, 1]} : vector<64x96xf32> to vector<8x96xf32>
    %cst_15 = arith.constant dense<0.000000e+00> : vector<8x96xf32>
    %52 = tpu.matmul %50, %6, %cst_15 {dimension_numbers = #tpu.dot_dimension_numbers<[1], [0], [0], [1], [0, 0, 1, 1], [], []>} : vector<8x32xf32>, vector<32x96xf32>, vector<8x96xf32> -> vector<8x96xf32>
    %53 = arith.addf %51, %52 : vector<8x96xf32>
    %54 = vector.extract_strided_slice %53 {offsets = [0, 0], sizes = [8, 32], strides = [1, 1]} : vector<8x96xf32> to vector<8x32xf32>
    %55 = arith.negf %54 : vector<8x32xf32>
    %56 = math.exp %55 : vector<8x32xf32>
    %cst_16 = arith.constant 1.000000e+00 : f32
    %57 = vector.broadcast %cst_16 : f32 to vector<8x32xf32>
    %58 = arith.addf %57, %56 : vector<8x32xf32>
    %59 = arith.divf %57, %58 : vector<8x32xf32>
    %60 = vector.extract_strided_slice %53 {offsets = [0, 32], sizes = [8, 32], strides = [1, 1]} : vector<8x96xf32> to vector<8x32xf32>
    %61 = arith.negf %60 : vector<8x32xf32>
    %62 = math.exp %61 : vector<8x32xf32>
    %cst_17 = arith.constant 1.000000e+00 : f32
    %63 = vector.broadcast %cst_17 : f32 to vector<8x32xf32>
    %64 = arith.addf %63, %62 : vector<8x32xf32>
    %65 = arith.divf %63, %64 : vector<8x32xf32>
    %66 = vector.extract_strided_slice %53 {offsets = [0, 64], sizes = [8, 32], strides = [1, 1]} : vector<8x96xf32> to vector<8x32xf32>
    %67 = math.tanh %66 : vector<8x32xf32>
    %68 = arith.mulf %59, %67 : vector<8x32xf32>
    %69 = arith.addf %48, %68 : vector<8x32xf32>
    %70 = math.tanh %69 : vector<8x32xf32>
    %71 = arith.mulf %65, %70 : vector<8x32xf32>
    %72 = vector.extract_strided_slice %5 {offsets = [24, 0], sizes = [8, 96], strides = [1, 1]} : vector<64x96xf32> to vector<8x96xf32>
    %cst_18 = arith.constant dense<0.000000e+00> : vector<8x96xf32>
    %73 = tpu.matmul %71, %6, %cst_18 {dimension_numbers = #tpu.dot_dimension_numbers<[1], [0], [0], [1], [0, 0, 1, 1], [], []>} : vector<8x32xf32>, vector<32x96xf32>, vector<8x96xf32> -> vector<8x96xf32>
    %74 = arith.addf %72, %73 : vector<8x96xf32>
    %75 = vector.extract_strided_slice %74 {offsets = [0, 0], sizes = [8, 32], strides = [1, 1]} : vector<8x96xf32> to vector<8x32xf32>
    %76 = arith.negf %75 : vector<8x32xf32>
    %77 = math.exp %76 : vector<8x32xf32>
    %cst_19 = arith.constant 1.000000e+00 : f32
    %78 = vector.broadcast %cst_19 : f32 to vector<8x32xf32>
    %79 = arith.addf %78, %77 : vector<8x32xf32>
    %80 = arith.divf %78, %79 : vector<8x32xf32>
    %81 = vector.extract_strided_slice %74 {offsets = [0, 32], sizes = [8, 32], strides = [1, 1]} : vector<8x96xf32> to vector<8x32xf32>
    %82 = arith.negf %81 : vector<8x32xf32>
    %83 = math.exp %82 : vector<8x32xf32>
    %cst_20 = arith.constant 1.000000e+00 : f32
    %84 = vector.broadcast %cst_20 : f32 to vector<8x32xf32>
    %85 = arith.addf %84, %83 : vector<8x32xf32>
    %86 = arith.divf %84, %85 : vector<8x32xf32>
    %87 = vector.extract_strided_slice %74 {offsets = [0, 64], sizes = [8, 32], strides = [1, 1]} : vector<8x96xf32> to vector<8x32xf32>
    %88 = math.tanh %87 : vector<8x32xf32>
    %89 = arith.mulf %80, %88 : vector<8x32xf32>
    %90 = arith.addf %69, %89 : vector<8x32xf32>
    %91 = math.tanh %90 : vector<8x32xf32>
    %92 = arith.mulf %86, %91 : vector<8x32xf32>
    %93 = vector.extract_strided_slice %5 {offsets = [32, 0], sizes = [8, 96], strides = [1, 1]} : vector<64x96xf32> to vector<8x96xf32>
    %cst_21 = arith.constant dense<0.000000e+00> : vector<8x96xf32>
    %94 = tpu.matmul %92, %6, %cst_21 {dimension_numbers = #tpu.dot_dimension_numbers<[1], [0], [0], [1], [0, 0, 1, 1], [], []>} : vector<8x32xf32>, vector<32x96xf32>, vector<8x96xf32> -> vector<8x96xf32>
    %95 = arith.addf %93, %94 : vector<8x96xf32>
    %96 = vector.extract_strided_slice %95 {offsets = [0, 0], sizes = [8, 32], strides = [1, 1]} : vector<8x96xf32> to vector<8x32xf32>
    %97 = arith.negf %96 : vector<8x32xf32>
    %98 = math.exp %97 : vector<8x32xf32>
    %cst_22 = arith.constant 1.000000e+00 : f32
    %99 = vector.broadcast %cst_22 : f32 to vector<8x32xf32>
    %100 = arith.addf %99, %98 : vector<8x32xf32>
    %101 = arith.divf %99, %100 : vector<8x32xf32>
    %102 = vector.extract_strided_slice %95 {offsets = [0, 32], sizes = [8, 32], strides = [1, 1]} : vector<8x96xf32> to vector<8x32xf32>
    %103 = arith.negf %102 : vector<8x32xf32>
    %104 = math.exp %103 : vector<8x32xf32>
    %cst_23 = arith.constant 1.000000e+00 : f32
    %105 = vector.broadcast %cst_23 : f32 to vector<8x32xf32>
    %106 = arith.addf %105, %104 : vector<8x32xf32>
    %107 = arith.divf %105, %106 : vector<8x32xf32>
    %108 = vector.extract_strided_slice %95 {offsets = [0, 64], sizes = [8, 32], strides = [1, 1]} : vector<8x96xf32> to vector<8x32xf32>
    %109 = math.tanh %108 : vector<8x32xf32>
    %110 = arith.mulf %101, %109 : vector<8x32xf32>
    %111 = arith.addf %90, %110 : vector<8x32xf32>
    %112 = math.tanh %111 : vector<8x32xf32>
    %113 = arith.mulf %107, %112 : vector<8x32xf32>
    %114 = vector.extract_strided_slice %5 {offsets = [40, 0], sizes = [8, 96], strides = [1, 1]} : vector<64x96xf32> to vector<8x96xf32>
    %cst_24 = arith.constant dense<0.000000e+00> : vector<8x96xf32>
    %115 = tpu.matmul %113, %6, %cst_24 {dimension_numbers = #tpu.dot_dimension_numbers<[1], [0], [0], [1], [0, 0, 1, 1], [], []>} : vector<8x32xf32>, vector<32x96xf32>, vector<8x96xf32> -> vector<8x96xf32>
    %116 = arith.addf %114, %115 : vector<8x96xf32>
    %117 = vector.extract_strided_slice %116 {offsets = [0, 0], sizes = [8, 32], strides = [1, 1]} : vector<8x96xf32> to vector<8x32xf32>
    %118 = arith.negf %117 : vector<8x32xf32>
    %119 = math.exp %118 : vector<8x32xf32>
    %cst_25 = arith.constant 1.000000e+00 : f32
    %120 = vector.broadcast %cst_25 : f32 to vector<8x32xf32>
    %121 = arith.addf %120, %119 : vector<8x32xf32>
    %122 = arith.divf %120, %121 : vector<8x32xf32>
    %123 = vector.extract_strided_slice %116 {offsets = [0, 32], sizes = [8, 32], strides = [1, 1]} : vector<8x96xf32> to vector<8x32xf32>
    %124 = arith.negf %123 : vector<8x32xf32>
    %125 = math.exp %124 : vector<8x32xf32>
    %cst_26 = arith.constant 1.000000e+00 : f32
    %126 = vector.broadcast %cst_26 : f32 to vector<8x32xf32>
    %127 = arith.addf %126, %125 : vector<8x32xf32>
    %128 = arith.divf %126, %127 : vector<8x32xf32>
    %129 = vector.extract_strided_slice %116 {offsets = [0, 64], sizes = [8, 32], strides = [1, 1]} : vector<8x96xf32> to vector<8x32xf32>
    %130 = math.tanh %129 : vector<8x32xf32>
    %131 = arith.mulf %122, %130 : vector<8x32xf32>
    %132 = arith.addf %111, %131 : vector<8x32xf32>
    %133 = math.tanh %132 : vector<8x32xf32>
    %134 = arith.mulf %128, %133 : vector<8x32xf32>
    %135 = vector.extract_strided_slice %5 {offsets = [48, 0], sizes = [8, 96], strides = [1, 1]} : vector<64x96xf32> to vector<8x96xf32>
    %cst_27 = arith.constant dense<0.000000e+00> : vector<8x96xf32>
    %136 = tpu.matmul %134, %6, %cst_27 {dimension_numbers = #tpu.dot_dimension_numbers<[1], [0], [0], [1], [0, 0, 1, 1], [], []>} : vector<8x32xf32>, vector<32x96xf32>, vector<8x96xf32> -> vector<8x96xf32>
    %137 = arith.addf %135, %136 : vector<8x96xf32>
    %138 = vector.extract_strided_slice %137 {offsets = [0, 0], sizes = [8, 32], strides = [1, 1]} : vector<8x96xf32> to vector<8x32xf32>
    %139 = arith.negf %138 : vector<8x32xf32>
    %140 = math.exp %139 : vector<8x32xf32>
    %cst_28 = arith.constant 1.000000e+00 : f32
    %141 = vector.broadcast %cst_28 : f32 to vector<8x32xf32>
    %142 = arith.addf %141, %140 : vector<8x32xf32>
    %143 = arith.divf %141, %142 : vector<8x32xf32>
    %144 = vector.extract_strided_slice %137 {offsets = [0, 32], sizes = [8, 32], strides = [1, 1]} : vector<8x96xf32> to vector<8x32xf32>
    %145 = arith.negf %144 : vector<8x32xf32>
    %146 = math.exp %145 : vector<8x32xf32>
    %cst_29 = arith.constant 1.000000e+00 : f32
    %147 = vector.broadcast %cst_29 : f32 to vector<8x32xf32>
    %148 = arith.addf %147, %146 : vector<8x32xf32>
    %149 = arith.divf %147, %148 : vector<8x32xf32>
    %150 = vector.extract_strided_slice %137 {offsets = [0, 64], sizes = [8, 32], strides = [1, 1]} : vector<8x96xf32> to vector<8x32xf32>
    %151 = math.tanh %150 : vector<8x32xf32>
    %152 = arith.mulf %143, %151 : vector<8x32xf32>
    %153 = arith.addf %132, %152 : vector<8x32xf32>
    %154 = math.tanh %153 : vector<8x32xf32>
    %155 = arith.mulf %149, %154 : vector<8x32xf32>
    %156 = vector.extract_strided_slice %5 {offsets = [56, 0], sizes = [8, 96], strides = [1, 1]} : vector<64x96xf32> to vector<8x96xf32>
    %cst_30 = arith.constant dense<0.000000e+00> : vector<8x96xf32>
    %157 = tpu.matmul %155, %6, %cst_30 {dimension_numbers = #tpu.dot_dimension_numbers<[1], [0], [0], [1], [0, 0, 1, 1], [], []>} : vector<8x32xf32>, vector<32x96xf32>, vector<8x96xf32> -> vector<8x96xf32>
    %158 = arith.addf %156, %157 : vector<8x96xf32>
    %159 = vector.extract_strided_slice %158 {offsets = [0, 0], sizes = [8, 32], strides = [1, 1]} : vector<8x96xf32> to vector<8x32xf32>
    %160 = arith.negf %159 : vector<8x32xf32>
    %161 = math.exp %160 : vector<8x32xf32>
    %cst_31 = arith.constant 1.000000e+00 : f32
    %162 = vector.broadcast %cst_31 : f32 to vector<8x32xf32>
    %163 = arith.addf %162, %161 : vector<8x32xf32>
    %164 = arith.divf %162, %163 : vector<8x32xf32>
    %165 = vector.extract_strided_slice %158 {offsets = [0, 32], sizes = [8, 32], strides = [1, 1]} : vector<8x96xf32> to vector<8x32xf32>
    %166 = arith.negf %165 : vector<8x32xf32>
    %167 = math.exp %166 : vector<8x32xf32>
    %cst_32 = arith.constant 1.000000e+00 : f32
    %168 = vector.broadcast %cst_32 : f32 to vector<8x32xf32>
    %169 = arith.addf %168, %167 : vector<8x32xf32>
    %170 = arith.divf %168, %169 : vector<8x32xf32>
    %171 = vector.extract_strided_slice %158 {offsets = [0, 64], sizes = [8, 32], strides = [1, 1]} : vector<8x96xf32> to vector<8x32xf32>
    %172 = math.tanh %171 : vector<8x32xf32>
    %173 = arith.mulf %164, %172 : vector<8x32xf32>
    %174 = arith.addf %153, %173 : vector<8x32xf32>
    %175 = math.tanh %174 : vector<8x32xf32>
    %176 = arith.mulf %170, %175 : vector<8x32xf32>
    %c0_33 = arith.constant 0 : index
    %c0_34 = arith.constant 0 : index
    %177 = vector.load %arg4[%c0_33, %c0_34] : memref<32x128xf32, #tpu.memory_space<vmem>>, vector<32x128xf32>
    %cst_35 = arith.constant dense<0.000000e+00> : vector<8x128xf32>
    %178 = tpu.matmul %176, %177, %cst_35 {dimension_numbers = #tpu.dot_dimension_numbers<[1], [0], [0], [1], [0, 0, 1, 1], [], []>} : vector<8x32xf32>, vector<32x128xf32>, vector<8x128xf32> -> vector<8x128xf32>
    %c0_36 = arith.constant 0 : index
    %c0_37 = arith.constant 0 : index
    %179 = vector.load %arg5[%c0_36, %c0_37] : memref<1x128xf32, #tpu.memory_space<vmem>>, vector<1x128xf32>
    %180 = vector.broadcast %179 : vector<1x128xf32> to vector<8x128xf32>
    %181 = arith.addf %178, %180 : vector<8x128xf32>
    %c0_38 = arith.constant 0 : index
    %c0_39 = arith.constant 0 : index
    %182 = vector.load %arg6[%c0_38, %c0_39] : memref<8x128xf32, #tpu.memory_space<vmem>>, vector<8x128xf32>
    tpu.vector_store %arg6[%c0_38, %c0_39], %181 {strides = array<i32>} : memref<8x128xf32, #tpu.memory_space<vmem>>, vector<8x128xf32>,
    return
  }
}

</mosaic_0001>

<bundles_post_ra>
// kernel: tpu_custom_call.1
= control target key start
LH: loop header
LB: loop body
LE: loop exit
PB: predicated region body
PF: predicated region fallthrough
CT: control target
= control target key end

     0   :  { %v1323_v3 = vmov 0.0   ;;  %vm41_vm0 = vcmask 130048   ;;  %s1584_s0 = inlined_call_operand.vmem [shape: f32[64,16], index: 0, kind: input, shape index: {}]   ;;  %s1585_s1 = inlined_call_operand.vmem [shape: f32[16,96], index: 1, kind: input, shape index: {}]   ;;  %s1586_s2 = inlined_call_operand.vmem [shape: f32[32,96], index: 2, kind: input, shape index: {}]   ;;  %s1587_s3 = inlined_call_operand.vmem [shape: f32[1,96], index: 3, kind: input, shape index: {}]   ;;  %s1588_s4 = inlined_call_operand.vmem [shape: f32[32,128], index: 4, kind: input, shape index: {}]   ;;  %s1589_s5 = inlined_call_operand.vmem [shape: f32[1,128], index: 5, kind: input, shape index: {}]   ;;  %s1590_s6 = inlined_call_operand.hbm [shape: f32[8,128], index: 6, kind: output, shape index: {}]  }
   0x1   :  { %v33_v0 = vld [vmem:[%s1585_s1 + $0x8] sm:$0xff]  ;;  %v1370_v1 = vld [vmem:[%s1586_s2 + $0x18] sm:$0xff]  ;;  %v32_v2 = vld [vmem:[%s1585_s1] sm:$0xff]  ;;  %1132 = vmatprep.subr.mxu1 %v1323_v3 }
   0x2   :  { %1116 = vmatprep.subr.mxu0 %v33_v0  ;;  %v24_v4 = vld [vmem:[%s1584_s0] sm:$0xff]  ;;  %1133 = vmatpush3.msra.mxu1 %v1370_v1  ;;  %v1383_v5 = vld [vmem:[%s1586_s2 + $0x10] sm:$0xff]  ;;  %v25_v6 = vld [vmem:[%s1584_s0 + $0x8] sm:$0xff] }
   0x3   :  { %1117 = vmatpush3.msra.mxu0 %v33_v0 }
   0x4   :  { %11 = vsyncpa [#allocation3], 0  ;;  %1118 = vmatprep.subr.mxu0 %v32_v2  ;;  %1134 = vmatprep.subr.mxu1 %v1323_v3  ;;  %v1393_v7 = vld [vmem:[%s1586_s2 + $0x8] sm:$0xff]  ;;  %v1401_v8 = vld [vmem:[%s1586_s2] sm:$0xff]  ;;  %vm1324_vm1 = vmmov 0   ;;  %s1325_s13 = smov 64  }
   0x5   :  { %1119 = vmatpush3.msra.mxu0 %v32_v2  ;;  %1120 = vmatprep.mubr.msk.f32.mxu0 %vm41_vm0, %v24_v4  ;;  %v1432_v10 = vld [vmem:[%s1587_s3] ss:$0 sm:$0xff]  ;;  %s1326_s3 = smov 32   ;;  %s1327_s14 = smov 96   ;;  %vm175_vm2 = vcmask 261120   ;;  %v26_v39 = vld [vmem:[%s1584_s0 + $0x10] sm:$0xff] }
   0x6   :  { %1135 = vmatpush3.msra.mxu1 %v1383_v5  ;;  %1121 = vmatmul.mubr.msk.f32.vlgmr.msra.gmra.mxu0 %vm41_vm0, %v25_v6  ;;  %v27_v40 = vld [vmem:[%s1584_s0 + $0x18] sm:$0xff]  ;;  %v28_v41 = vld [vmem:[%s1584_s0 + $0x20] sm:$0xff]  ;;  %v29_v42 = vld [vmem:[%s1584_s0 + $0x28] sm:$0xff]  ;;  %s1328_s11 = smov [#allocation2]  }
   0x7   :  { %1136 = vmatprep.subr.mxu1 %v1323_v3  ;;  %1140 = vmatprep.mubr.msk.f32.mxu1 %vm1324_vm1, %v1323_v3  ;;  %v30_v43 = vld [vmem:[%s1584_s0 + $0x30] sm:$0xff]  ;;  %v31_v44 = vld [vmem:[%s1584_s0 + $0x38] sm:$0xff] }
   0x8   :  { %1137 = vmatpush3.msra.mxu1 %v1393_v7  ;;  %1154 = vmatprep.subr.mxu0 %v1323_v3 }
   0x9   :  { %1138 = vmatprep.subr.mxu1 %v1323_v3  ;;  %1155 = vmatpush3.msra.mxu0 %v1370_v1 }
   0xa   :  { %1139 = vmatpush3.msra.mxu1 %v1401_v8  ;;  %1156 = vmatprep.subr.mxu0 %v1323_v3 }
   0xb   :  { %1141 = vmatmul.mubr.f32.vlgmr.msra.gmra.mxu1 %v1323_v3  ;;  %1143 = vmatprep.subr.mxu1 %v1323_v3 }
   0xc   :  { %1144 = vmatpush3.msra.mxu1 %v1370_v1  ;;  %1151 = vmatprep.mubr.msk.f32.mxu1 %vm1324_vm1, %v1323_v3 }
   0xd   :  { %1145 = vmatprep.subr.mxu1 %v1323_v3  ;;  %1157 = vmatpush3.msra.mxu0 %v1383_v5 }
   0xe   :  { %1146 = vmatpush3.msra.mxu1 %v1383_v5  ;;  %1158 = vmatprep.subr.mxu0 %v1323_v3 }
   0xf   :  { %1147 = vmatprep.subr.mxu1 %v1323_v3  ;;  %1159 = vmatpush3.msra.mxu0 %v1393_v7 }
  0x10   :  { %1148 = vmatpush3.msra.mxu1 %v1393_v7  ;;  %1160 = vmatprep.subr.mxu0 %v1323_v3 }
  0x11   :  { %1149 = vmatprep.subr.mxu1 %v1323_v3  ;;  %1161 = vmatpush3.msra.mxu0 %v1401_v8 }
  0x12   :  { %1150 = vmatpush3.msra.mxu1 %v1401_v8  ;;  %1176 = vmatprep.subr.mxu0 %v1323_v3 }
  0x13   :  { %1165 = vmatprep.subr.mxu1 %v1323_v3  ;;  %1123 = vmatprep.mubr.msk.f32.mxu0 %vm41_vm0, %v26_v39 }
  0x14   :  { %1124 = vmatmul.mubr.msk.f32.gmra.mxu0 %vm41_vm0, %v27_v40 }
  0x15   :  { %1126 = vmatprep.mubr.msk.f32.mxu0 %vm41_vm0, %v28_v41 }
  0x18   :  { %1127 = vmatmul.mubr.msk.f32.gmra.mxu0 %vm41_vm0, %v29_v42 }
  0x19   :  { %1129 = vmatprep.mubr.msk.f32.mxu0 %vm41_vm0, %v30_v43 }
  0x1c   :  { %1130 = vmatmul.mubr.msk.f32.gmra.mxu0 %vm41_vm0, %v31_v44 }
  0x1d   :  { %1162 = vmatprep.mubr.msk.f32.mxu0 %vm1324_vm1, %v1323_v3 }
  0xc6   :  { %v1122_v9 = vpop.f32.mrf.mxu0 }
  0xc7   :  { %v138_v27 = vadd.f32 %v1122_v9, %v1432_v10 }
  0xc8   :  { %v132_v11 = vpop.f32.mrf.mxu0 }
  0xc9   :  { %v133_v12 = vadd.f32 %v1432_v10, %v132_v11 }
  0xcb   :  { %v245_v13 = vpop.f32.mrf.mxu1 }
  0xcc   :  { %v249_v14 = vadd.f32 %v245_v13, %v133_v12 }
  0xcd   :  { %v1142_v15 = vpop.f32.mrf.mxu1 }
  0xce   :  { %1237 = vtanh.f32 %v249_v14  ;;  %v1044_v17 = vmul.f32 -1.442695, %v249_v14 }
  0xd0   :  { %1239 = vpow2.f32 %v1044_v17 }
  0xd4   :  { %v1125_v49 = vpop.f32.mrf.mxu0 }
  0xd5   :  { %v148_v13 = vadd.f32 %v1125_v49, %v1432_v10 }
  0xd6   :  { %v142_v50 = vpop.f32.mrf.mxu0 }
  0xd7   :  { %v143_v55 = vadd.f32 %v1432_v10, %v142_v50 }
  0xd8   :  { %v1490_v51 = vpop.f32.mrf.mxu0 }
  0xda   :  { %v1492_v52 = vpop.f32.mrf.mxu0 }
  0xdb   :  { %v1238_v16 = vpop.eup %1237 }
  0xdc   :  { %258 = vrot.lane.b32.xlu0 %v1238_v16, %s1325_s13  ;;  %v1494_v53 = vpop.f32.mrf.mxu0 }
  0xdd   :  { %v1240_v18 = vpop.eup %1239 }
  0xde   :  { %v253_v19 = vadd.f32 1.0, %v1240_v18  ;;  %v1496_v54 = vpop.f32.mrf.mxu0 }
  0xe0   :  { %1241 = vrcp.f32 %v253_v19 }
  0xed   :  { %v1242_v20 = vpop.eup %1241 }
 0x14e   :  { %v259_v21 = vpop.permute.xlu0 %258 }
 0x14f   :  { %v261_v22 = vmul.f32 %v1242_v20, %v259_v21 }
 0x151   :  { %1243 = vtanh.f32 %v261_v22 }
 0x15e   :  { %v1244_v23 = vpop.eup %1243 }
 0x15f   :  { %265 = vrot.lane.b32.xlu0 %v1244_v23, %s1326_s3 }
 0x1d1   :  { %v266_v24 = vpop.permute.xlu0 %265 }
 0x1d2   :  { %v268_v25 = vmul.f32 %v1242_v20, %v266_v24 }
 0x1d4   :  { %270 = vrot.lane.b32.xlu1 %v268_v25, %s1327_s14 }
 0x246   :  { %v271_v26 = vpop.permute.xlu1 %270 }
 0x247   :  { %1152 = vmatmul.mubr.msk.f32.vlgmr.msra.gmra.mxu1 %vm175_vm2, %v271_v26 }
 0x248   :  { %1166 = vmatpush3.msra.mxu1 %v1370_v1  ;;  %1173 = vmatprep.mubr.msk.f32.mxu1 %vm1324_vm1, %v1323_v3 }
 0x249   :  { %1167 = vmatprep.subr.mxu1 %v1323_v3 }
 0x24a   :  { %1168 = vmatpush3.msra.mxu1 %v1383_v5 }
 0x24b   :  { %1169 = vmatprep.subr.mxu1 %v1323_v3 }
 0x24c   :  { %1170 = vmatpush3.msra.mxu1 %v1393_v7 }
 0x24d   :  { %1171 = vmatprep.subr.mxu1 %v1323_v3 }
 0x24e   :  { %1172 = vmatpush3.msra.mxu1 %v1401_v8 }
 0x24f   :  { %1187 = vmatprep.subr.mxu1 %v1323_v3 }
 0x307   :  { %v340_v28 = vpop.f32.mrf.mxu1 }
 0x308   :  { %v344_v29 = vadd.f32 %v340_v28, %v138_v27 }
 0x309   :  { %v1153_v30 = vpop.f32.mrf.mxu1 }
 0x30a   :  { %1245 = vtanh.f32 %v344_v29  ;;  %v1046_v32 = vmul.f32 -1.442695, %v344_v29  ;;  %v153_v29 = vadd.f32 %v1432_v10, %v1492_v52 }
 0x30c   :  { %1247 = vpow2.f32 %v1046_v32 }
 0x317   :  { %v1246_v31 = vpop.eup %1245 }
 0x318   :  { %353 = vrot.lane.b32.xlu1 %v1246_v31, %s1325_s13 }
 0x319   :  { %v1248_v33 = vpop.eup %1247 }
 0x31a   :  { %v348_v34 = vadd.f32 1.0, %v1248_v33 }
 0x31c   :  { %1249 = vrcp.f32 %v348_v34 }
 0x329   :  { %v1250_v35 = vpop.eup %1249 }
 0x38a   :  { %v354_v36 = vpop.permute.xlu1 %353 }
 0x38b   :  { %v356_v37 = vmul.f32 %v1250_v35, %v354_v36 }
 0x38d   :  { %v357_v38 = vadd.f32 %v356_v37, %v261_v22 }
 0x38f   :  { %1251 = vtanh.f32 %v357_v38 }
 0x39c   :  { %v1252_v45 = vpop.eup %1251 }
 0x39d   :  { %360 = vrot.lane.b32.xlu0 %v1252_v45, %s1326_s3  ;;  %v158_v45 = vadd.f32 %v1490_v51, %v1432_v10 }
 0x40f   :  { %v361_v46 = vpop.permute.xlu0 %360 }
 0x410   :  { %v363_v47 = vmul.f32 %v1250_v35, %v361_v46 }
 0x412   :  { %365 = vrot.lane.b32.xlu1 %v363_v47, %s1327_s14 }
 0x484   :  { %v366_v48 = vpop.permute.xlu1 %365 }
 0x485   :  { %1163 = vmatmul.mubr.msk.f32.vlgmr.msra.gmra.mxu0 %vm175_vm2, %v366_v48 }
 0x486   :  { %1177 = vmatpush3.msra.mxu0 %v1370_v1  ;;  %1184 = vmatprep.mubr.msk.f32.mxu0 %vm1324_vm1, %v1323_v3 }
 0x487   :  { %1178 = vmatprep.subr.mxu0 %v1323_v3 }
 0x488   :  { %1179 = vmatpush3.msra.mxu0 %v1383_v5 }
 0x489   :  { %1180 = vmatprep.subr.mxu0 %v1323_v3 }
 0x48a   :  { %1181 = vmatpush3.msra.mxu0 %v1393_v7 }
 0x48b   :  { %1182 = vmatprep.subr.mxu0 %v1323_v3 }
 0x48c   :  { %1183 = vmatpush3.msra.mxu0 %v1401_v8 }
 0x48d   :  { %1198 = vmatprep.subr.mxu0 %v1323_v3 }
 0x545   :  { %v435_v56 = vpop.f32.mrf.mxu0 }
 0x546   :  { %v439_v57 = vadd.f32 %v435_v56, %v143_v55 }
 0x547   :  { %v1164_v58 = vpop.f32.mrf.mxu0 }
 0x548   :  { %1253 = vtanh.f32 %v439_v57  ;;  %v1048_v60 = vmul.f32 -1.442695, %v439_v57 }
 0x54a   :  { %1255 = vpow2.f32 %v1048_v60 }
 0x555   :  { %v1254_v59 = vpop.eup %1253 }
 0x556   :  { %448 = vrot.lane.b32.xlu0 %v1254_v59, %s1325_s13  ;;  %v163_v59 = vadd.f32 %v1432_v10, %v1496_v54 }
 0x557   :  { %v1256_v61 = vpop.eup %1255 }
 0x558   :  { %v443_v62 = vadd.f32 1.0, %v1256_v61 }
 0x55a   :  { %1257 = vrcp.f32 %v443_v62 }
 0x567   :  { %v1258_v63 = vpop.eup %1257 }
 0x5c8   :  { %v449_v0 = vpop.permute.xlu0 %448 }
 0x5c9   :  { %v451_v2 = vmul.f32 %v1258_v63, %v449_v0 }
 0x5cb   :  { %v452_v4 = vadd.f32 %v451_v2, %v357_v38 }
 0x5cd   :  { %1259 = vtanh.f32 %v452_v4 }
 0x5da   :  { %v1260_v6 = vpop.eup %1259 }
 0x5db   :  { %455 = vrot.lane.b32.xlu1 %v1260_v6, %s1326_s3 }
 0x64d   :  { %v456_v9 = vpop.permute.xlu1 %455 }
 0x64e   :  { %v458_v11 = vmul.f32 %v1258_v63, %v456_v9 }
 0x650   :  { %460 = vrot.lane.b32.xlu0 %v458_v11, %s1327_s14 }
 0x6c2   :  { %v461_v12 = vpop.permute.xlu0 %460 }
 0x6c3   :  { %1174 = vmatmul.mubr.msk.f32.vlgmr.msra.gmra.mxu1 %vm175_vm2, %v461_v12 }
 0x6c4   :  { %1188 = vmatpush3.msra.mxu1 %v1370_v1  ;;  %1195 = vmatprep.mubr.msk.f32.mxu1 %vm1324_vm1, %v1323_v3 }
 0x6c5   :  { %1189 = vmatprep.subr.mxu1 %v1323_v3 }
 0x6c6   :  { %1190 = vmatpush3.msra.mxu1 %v1383_v5 }
 0x6c7   :  { %1191 = vmatprep.subr.mxu1 %v1323_v3 }
 0x6c8   :  { %1192 = vmatpush3.msra.mxu1 %v1393_v7 }
 0x6c9   :  { %1193 = vmatprep.subr.mxu1 %v1323_v3 }
 0x6ca   :  { %1194 = vmatpush3.msra.mxu1 %v1401_v8 }
 0x6cb   :  { %1209 = vmatprep.subr.mxu1 %v1323_v3 }
 0x783   :  { %v530_v14 = vpop.f32.mrf.mxu1 }
 0x784   :  { %v534_v15 = vadd.f32 %v530_v14, %v148_v13 }
 0x785   :  { %v1175_v16 = vpop.f32.mrf.mxu1 }
 0x786   :  { %1261 = vtanh.f32 %v534_v15  ;;  %v1050_v18 = vmul.f32 -1.442695, %v534_v15  ;;  %v168_v16 = vadd.f32 %v1494_v53, %v1432_v10  ;;  %v937_v10 = vld [vmem:[%s1588_s4 + $0x18] sm:$0xff]  ;;  %v936_v53 = vld [vmem:[%s1588_s4 + $0x10] sm:$0xff] }
 0x788   :  { %1263 = vpow2.f32 %v1050_v18 }
 0x793   :  { %v1262_v17 = vpop.eup %1261 }
 0x794   :  { %543 = vrot.lane.b32.xlu1 %v1262_v17, %s1325_s13 }
 0x795   :  { %v1264_v19 = vpop.eup %1263 }
 0x796   :  { %v538_v20 = vadd.f32 1.0, %v1264_v19 }
 0x798   :  { %1265 = vrcp.f32 %v538_v20 }
 0x7a5   :  { %v1266_v21 = vpop.eup %1265 }
 0x806   :  { %v544_v22 = vpop.permute.xlu1 %543 }
 0x807   :  { %v546_v23 = vmul.f32 %v1266_v21, %v544_v22 }
 0x809   :  { %v547_v24 = vadd.f32 %v546_v23, %v452_v4 }
 0x80b   :  { %1267 = vtanh.f32 %v547_v24 }
 0x818   :  { %v1268_v25 = vpop.eup %1267 }
 0x819   :  { %550 = vrot.lane.b32.xlu0 %v1268_v25, %s1326_s3 }
 0x88b   :  { %v551_v26 = vpop.permute.xlu0 %550 }
 0x88c   :  { %v553_v27 = vmul.f32 %v1266_v21, %v551_v26 }
 0x88e   :  { %555 = vrot.lane.b32.xlu1 %v553_v27, %s1327_s14 }
 0x900   :  { %v556_v28 = vpop.permute.xlu1 %555 }
 0x901   :  { %1185 = vmatmul.mubr.msk.f32.vlgmr.msra.gmra.mxu0 %vm175_vm2, %v556_v28  ;;  %v935_v28 = vld [vmem:[%s1588_s4 + $0x8] sm:$0xff] }
 0x902   :  { %1199 = vmatpush3.msra.mxu0 %v1370_v1  ;;  %1206 = vmatprep.mubr.msk.f32.mxu0 %vm1324_vm1, %v1323_v3 }
 0x903   :  { %1200 = vmatprep.subr.mxu0 %v1323_v3 }
 0x904   :  { %1201 = vmatpush3.msra.mxu0 %v1383_v5 }
 0x905   :  { %1202 = vmatprep.subr.mxu0 %v1323_v3 }
 0x906   :  { %1203 = vmatpush3.msra.mxu0 %v1393_v7 }
 0x907   :  { %1204 = vmatprep.subr.mxu0 %v1323_v3 }
 0x908   :  { %1205 = vmatpush3.msra.mxu0 %v1401_v8 }
 0x909   :  { %1220 = vmatprep.subr.mxu0 %v1323_v3 }
 0x9c1   :  { %v625_v30 = vpop.f32.mrf.mxu0 }
 0x9c2   :  { %v629_v31 = vadd.f32 %v625_v30, %v153_v29  ;;  %v934_v29 = vld [vmem:[%s1588_s4] sm:$0xff]  ;;  %s1027_s4 = sshll.u32 %s1328_s11, 4  ;;  %s1028_s4 = int_to_ptr.vmem [resolvable:$true] %s1027_s4 }
 0x9c3   :  { %v1186_v32 = vpop.f32.mrf.mxu0  ;;  %s1301_s2 = scalar_lea.vmem %s1028_s4, 128  ;;  %p1306_p1 = scmp.lt.s32.totalorder %s1028_s4, %s1028_s4 }
 0x9c4   :  { %1269 = vtanh.f32 %v629_v31  ;;  %v1052_v34 = vmul.f32 -1.442695, %v629_v31  ;;  %p1302_p0 = scmp.ne.s32.totalorder %s1028_s4, %s1301_s2  ;;  %p1307_p2 = scmp.lt.s32.totalorder %s1301_s2, %s1301_s2 }
 0x9c6   :  { %1271 = vpow2.f32 %v1052_v34  ;;  %v1059_v34 = vld [vmem:[%s1589_s5] ss:$0 sm:$0xff]  ;;  %p1308_p3 = por %p1307_p2, %p1306_p1 }
 0x9c8   :  { %p1309_p4 = pnand %p1308_p3, %p1302_p0 }
 0x9d1   :  { %v1270_v33 = vpop.eup %1269 }
 0x9d2   :  { %638 = vrot.lane.b32.xlu0 %v1270_v33, %s1325_s13 }
 0x9d3   :  { %v1272_v35 = vpop.eup %1271 }
 0x9d4   :  { %v633_v36 = vadd.f32 1.0, %v1272_v35 }
 0x9d6   :  { %1273 = vrcp.f32 %v633_v36 }
 0x9e3   :  { %v1274_v37 = vpop.eup %1273 }
 0xa44   :  { %v639_v38 = vpop.permute.xlu0 %638 }
 0xa45   :  { %v641_v39 = vmul.f32 %v1274_v37, %v639_v38 }
 0xa47   :  { %v642_v40 = vadd.f32 %v641_v39, %v547_v24 }
 0xa49   :  { %1275 = vtanh.f32 %v642_v40 }
 0xa56   :  { %v1276_v41 = vpop.eup %1275 }
 0xa57   :  { %645 = vrot.lane.b32.xlu1 %v1276_v41, %s1326_s3 }
 0xac9   :  { %v646_v42 = vpop.permute.xlu1 %645 }
 0xaca   :  { %v648_v43 = vmul.f32 %v1274_v37, %v646_v42 }
 0xacc   :  { %650 = vrot.lane.b32.xlu0 %v648_v43, %s1327_s14 }
 0xb3e   :  { %v651_v44 = vpop.permute.xlu0 %650 }
 0xb3f   :  { %1196 = vmatmul.mubr.msk.f32.vlgmr.msra.gmra.mxu1 %vm175_vm2, %v651_v44 }
 0xb40   :  { %1210 = vmatpush3.msra.mxu1 %v1370_v1  ;;  %1217 = vmatprep.mubr.msk.f32.mxu1 %vm1324_vm1, %v1323_v3 }
 0xb41   :  { %1211 = vmatprep.subr.mxu1 %v1323_v3 }
 0xb42   :  { %1212 = vmatpush3.msra.mxu1 %v1383_v5 }
 0xb43   :  { %1213 = vmatprep.subr.mxu1 %v1323_v3 }
 0xb44   :  { %1214 = vmatpush3.msra.mxu1 %v1393_v7 }
 0xb45   :  { %1215 = vmatprep.subr.mxu1 %v1323_v3 }
 0xb46   :  { %1216 = vmatpush3.msra.mxu1 %v1401_v8 }
 0xbff   :  { %v720_v46 = vpop.f32.mrf.mxu1 }
 0xc00   :  { %v724_v1 = vadd.f32 %v720_v46, %v158_v45 }
 0xc01   :  { %v1197_v47 = vpop.f32.mrf.mxu1 }
 0xc02   :  { %1277 = vtanh.f32 %v724_v1  ;;  %v1054_v49 = vmul.f32 -1.442695, %v724_v1 }
 0xc04   :  { %1279 = vpow2.f32 %v1054_v49 }
 0xc0f   :  { %v1278_v48 = vpop.eup %1277 }
 0xc10   :  { %733 = vrot.lane.b32.xlu1 %v1278_v48, %s1325_s13 }
 0xc11   :  { %v1280_v5 = vpop.eup %1279 }
 0xc12   :  { %v728_v50 = vadd.f32 1.0, %v1280_v5 }
 0xc14   :  { %1281 = vrcp.f32 %v728_v50 }
 0xc21   :  { %v1282_v7 = vpop.eup %1281 }
 0xc82   :  { %v734_v52 = vpop.permute.xlu1 %733 }
 0xc83   :  { %v736_v55 = vmul.f32 %v1282_v7, %v734_v52 }
 0xc85   :  { %v737_v56 = vadd.f32 %v736_v55, %v642_v40 }
 0xc87   :  { %1283 = vtanh.f32 %v737_v56 }
 0xc94   :  { %v1284_v8 = vpop.eup %1283 }
 0xc95   :  { %740 = vrot.lane.b32.xlu0 %v1284_v8, %s1326_s3 }
 0xd07   :  { %v741_v51 = vpop.permute.xlu0 %740 }
 0xd08   :  { %v743_v57 = vmul.f32 %v1282_v7, %v741_v51 }
 0xd0a   :  { %745 = vrot.lane.b32.xlu1 %v743_v57, %s1327_s14 }
 0xd7c   :  { %v746_v58 = vpop.permute.xlu1 %745 }
 0xd7d   :  { %1207 = vmatmul.mubr.msk.f32.vlgmr.msra.gmra.mxu0 %vm175_vm2, %v746_v58 }
 0xd7e   :  { %1228 = vmatprep.mubr.msk.f32.mxu0 %vm1324_vm1, %v1323_v3  ;;  %1221 = vmatpush3.msra.mxu0 %v937_v10 }
 0xd7f   :  { %1222 = vmatprep.subr.mxu0 %v1323_v3 }
 0xd80   :  { %1223 = vmatpush3.msra.mxu0 %v936_v53 }
 0xd81   :  { %1224 = vmatprep.subr.mxu0 %v1323_v3 }
 0xd82   :  { %1225 = vmatpush3.msra.mxu0 %v935_v28 }
 0xd83   :  { %1226 = vmatprep.subr.mxu0 %v1323_v3 }
 0xd84   :  { %1227 = vmatpush3.msra.mxu0 %v934_v29 }
 0xe3d   :  { %v815_v60 = vpop.f32.mrf.mxu0 }
 0xe3e   :  { %v819_v61 = vadd.f32 %v815_v60, %v163_v59 }
 0xe3f   :  { %v1208_v62 = vpop.f32.mrf.mxu0 }
 0xe40   :  { %1285 = vtanh.f32 %v819_v61  ;;  %v1056_v0 = vmul.f32 -1.442695, %v819_v61 }
 0xe42   :  { %1287 = vpow2.f32 %v1056_v0 }
 0xe4d   :  { %v1286_v63 = vpop.eup %1285 }
 0xe4e   :  { %828 = vrot.lane.b32.xlu0 %v1286_v63, %s1325_s13 }
 0xe4f   :  { %v1288_v2 = vpop.eup %1287 }
 0xe50   :  { %v823_v4 = vadd.f32 1.0, %v1288_v2 }
 0xe52   :  { %1289 = vrcp.f32 %v823_v4 }
 0xe5f   :  { %v1290_v6 = vpop.eup %1289 }
 0xec0   :  { %v829_v9 = vpop.permute.xlu0 %828 }
 0xec1   :  { %v831_v11 = vmul.f32 %v1290_v6, %v829_v9 }
 0xec3   :  { %v832_v12 = vadd.f32 %v831_v11, %v737_v56 }
 0xec5   :  { %1291 = vtanh.f32 %v832_v12 }
 0xed2   :  { %v1292_v13 = vpop.eup %1291 }
 0xed3   :  { %835 = vrot.lane.b32.xlu1 %v1292_v13, %s1326_s3 }
 0xf45   :  { %v836_v54 = vpop.permute.xlu1 %835 }
 0xf46   :  { %v838_v14 = vmul.f32 %v1290_v6, %v836_v54 }
 0xf48   :  { %840 = vrot.lane.b32.xlu0 %v838_v14, %s1327_s14 }
 0xfba   :  { %v841_v15 = vpop.permute.xlu0 %840 }
 0xfbb   :  { %1218 = vmatmul.mubr.msk.f32.vlgmr.msra.gmra.mxu1 %vm175_vm2, %v841_v15 }
0x107b   :  { %v910_v17 = vpop.f32.mrf.mxu1 }
0x107c   :  { %v914_v18 = vadd.f32 %v910_v17, %v168_v16 }
0x107d   :  { %v1219_v19 = vpop.f32.mrf.mxu1 }
0x107e   :  { %1293 = vtanh.f32 %v914_v18  ;;  %v1058_v21 = vmul.f32 -1.442695, %v914_v18 }
0x1080   :  { %1295 = vpow2.f32 %v1058_v21 }
0x108b   :  { %v1294_v20 = vpop.eup %1293 }
0x108c   :  { %923 = vrot.lane.b32.xlu1 %v1294_v20, %s1325_s13 }
0x108d   :  { %v1296_v22 = vpop.eup %1295 }
0x108e   :  { %v918_v23 = vadd.f32 1.0, %v1296_v22 }
0x1090   :  { %1297 = vrcp.f32 %v918_v23 }
0x109d   :  { %v1298_v24 = vpop.eup %1297 }
0x10fe   :  { %v924_v25 = vpop.permute.xlu1 %923 }
0x10ff   :  { %v926_v26 = vmul.f32 %v1298_v24, %v924_v25 }
0x1101   :  { %v927_v27 = vadd.f32 %v926_v26, %v832_v12 }
0x1103   :  { %1299 = vtanh.f32 %v927_v27 }
0x1110   :  { %v1300_v30 = vpop.eup %1299 }
0x1111   :  { %930 = vrot.lane.b32.xlu0 %v1300_v30, %s1326_s3 }
0x1183   :  { %v931_v31 = vpop.permute.xlu0 %930 }
0x1184   :  { %v933_v32 = vmul.f32 %v1298_v24, %v931_v31 }
0x1186   :  { %946 = vrot.lane.b32.xlu1 %v933_v32, %s1327_s14 }
0x11f8   :  { %v947_v33 = vpop.permute.xlu1 %946 }
0x11f9   :  { %1229 = vmatmul.mubr.msk.f32.vlgmr.msra.gmra.mxu0 %vm175_vm2, %v947_v33 }
0x12b9   :  { %v1016_v35 = vpop.f32.mrf.mxu0 }
0x12ba   :  { %v1017_v36 = vadd.f32 %v1059_v34, %v1016_v35 }
0x12bb   :  { %v1230_v3 = vpop.f32.mrf.mxu0 }
0x12bc   :  { %1020 = vst [vmem:[#allocation2] sm:$0xff] %v1017_v36 }
0x12bd   :  { %1312 = shalt.err (!%p1309_p4)
}
0x12be   :  { %1030 = dma.vmem_to_hbm [thread:$0]  %s1028_s4, 128, %s1590_s6, [#allocation3]  }
0x12bf   :  { %1321 = dma.done.wait [#allocation3], 128  }
0x12c0   :  { %1322 = vsyncadd [#allocation3], 4294967168 }
0x12c1   :  { %1034 = vsyncpa [#allocation3], 1 }

</bundles_post_ra>
